<compile_context>
chip_gen: v6e
topology: v6e:2x2x1
jax: 0.10.0
libtpu: 0.0.40
codegen_flags: <defaults>
</compile_context>

<pallas_src>
import math

import jax
import jax.numpy as jnp
from jax.experimental import pallas as pl
from jax.experimental.pallas import tpu as pltpu

# ---- small, forward-consistent config --------------------------------------
B = 2          # batch
S = 8          # sequence length
H = 32         # transformer hidden size
NH = 4         # attention heads
DH = H // NH   # head dim
FF = 64        # FFN intermediate size
OUT = 3        # output_dim of the sentiment head
V = 50         # vocab size
VPAD = 64      # vocab padded for the slab (also the weight-slab row count)
BS = B * S     # flattened token rows
LN_EPS = 1e-12

# f32 slab (bias / pos / mask) row layout
R_POS = 16     # rows 16:32  -> pos_emb tiled per batch row, cols 0:H
R_MASK = 32    # rows 32:48  -> additive block-diagonal mask, cols 0:BS
FV_ROWS = 48
FV_COLS = 384  # 3 lane tiles (row 0 carries the fused QKV bias at 0/128/256)

# bf16 weight slab column layout (8 lane tiles)
C_QKV = 128    # Wq*scale @ 128:160, Wk @ 256:288, Wv @ 384:416
C_W1 = 512     # FFN up   @ 512:576
C_W2 = 640     # FFN down @ 640:672 (rows 0:FF)
C_WO = 768     # Wo head h @ rows 16h:16h+DH, cols 768:800
C_FC = 896     # head     @ 896:899
W_COLS = 1024

assert S & (S - 1) == 0 and H == NH * DH


def _layer_norm(x, gamma, beta):
    # var = E[x^2] - mean^2 : two independent lane reductions (pipeline on XLU)
    mean = jnp.mean(x, axis=-1, keepdims=True)
    mean_sq = jnp.mean(x * x, axis=-1, keepdims=True)
    var = mean_sq - mean * mean
    return (x - mean) * jax.lax.rsqrt(var + LN_EPS) * gamma + beta


def _gelu_tanh(x):
    c = math.sqrt(2.0 / math.pi)
    return 0.5 * x * (1.0 + jnp.tanh(c * (x + 0.044715 * x * x * x)))


# -----------------------------------------------------------------------------
# Kernel: one call, no grid, everything resident in VMEM.
# -----------------------------------------------------------------------------
def sentiment_kernel(ids_ref, w_ref, fv_ref, out_ref):
    f32 = jnp.float32
    bf16 = jnp.bfloat16

    def bias(row, width):                     # (1, width) f32 slab row; each
        return fv_ref[row:row + 1, 0:width]   # row is consumed exactly once

    def mm(a, w):                             # bf16 MXU matmul, f32 accumulate
        return jnp.dot(a.astype(bf16), w, preferred_element_type=f32)

    # ---- embedding lookup as an exact one-hot bf16 matmul (single MXU pass) -
    ids = ids_ref[...]                                            # (BS, 1) i32
    vocab_iota = jax.lax.broadcasted_iota(jnp.int32, (BS, VPAD), 1)
    onehot = jnp.where(vocab_iota == ids, 1.0, 0.0).astype(bf16)  # (BS, VPAD)
    x = jnp.dot(onehot, w_ref[0:VPAD, 0:H], preferred_element_type=f32) \
        + fv_ref[R_POS:R_POS + BS, 0:H]                           # (BS, H) f32

    # ---- fused Q/K/V projection (1/sqrt(DH) folded into Wq and bq) ----------
    qkv = mm(x, w_ref[0:H, C_QKV:C_QKV + 384]) + bias(0, 384)     # (BS, 384)
    q = qkv[:, 0:H]                 # already scaled by 1/sqrt(DH)
    k = qkv[:, 128:128 + H]
    v = qkv[:, 256:256 + H]

    # precomputed additive block-diagonal mask (0 within batch, -1e30 across)
    mask = fv_ref[R_MASK:R_MASK + BS, 0:BS]                       # (BS, BS)

    # ---- phase 1: per-head context with deferred softmax normalization ------
    ctxs = []
    for h in range(NH):                                           # static unroll
        sl = slice(h * DH, (h + 1) * DH)
        s = jax.lax.dot_general(q[:, sl].astype(bf16), k[:, sl].astype(bf16),
                                (((1,), (1,)), ((), ())),
                                preferred_element_type=f32) + mask
        p = jnp.exp(s - jnp.max(s, axis=-1, keepdims=True))       # f32 probs
        ctx = jnp.dot(p.astype(bf16), v[:, sl].astype(bf16),
                      preferred_element_type=f32)                 # (BS, DH)
        # normalize the small (BS, DH) ctx after the MXU push, not p itself
        ctxs.append(ctx * pl.reciprocal(jnp.sum(p, axis=-1, keepdims=True),
                                        approx=True))

    # ---- phase 2: back-to-back accumulating per-head output projections -----
    attn = bias(1, H)                                             # bo
    for h in range(NH):
        attn = attn + mm(ctxs[h], w_ref[16 * h:16 * h + DH, C_WO:C_WO + H])

    h1 = _layer_norm(x + attn, bias(2, H), bias(3, H))            # (BS, H)

    # ---- FFN ----------------------------------------------------------------
    ff = _gelu_tanh(mm(h1, w_ref[0:H, C_W1:C_W1 + FF]) + bias(4, FF))
    ff = mm(ff, w_ref[0:FF, C_W2:C_W2 + H]) + bias(5, H)
    hidden = _layer_norm(h1 + ff, bias(6, H), bias(7, H))         # last_hidden

    # ---- classification head on all rows; CLS rows picked from the result ---
    pred = mm(jnp.tanh(hidden), w_ref[0:H, C_FC:C_FC + OUT]) + bias(8, OUT)
    out_ref[...] = jnp.concatenate([pred[0:1, :], pred[S:S + 1, :]], axis=0)


@jax.jit
def review_sentiment_forward(ids, packed):
    ids2 = ids.reshape(BS, 1).astype(jnp.int32)
    vmem = pl.BlockSpec(memory_space=pltpu.MemorySpace.VMEM)
    return pl.pallas_call(
        sentiment_kernel,
        out_shape=jax.ShapeDtypeStruct((B, OUT), jnp.float32),
        in_specs=[vmem] * 3,
        out_specs=vmem,
    )(ids2, packed["w"], packed["fv"])


# ---------------------------- host-side packing ------------------------------
def pack_params(p):
    f32, bf16 = jnp.float32, jnp.bfloat16
    scale = 1.0 / math.sqrt(DH)

    # ---- bf16 weight slab (VPAD=64 rows x 1024 lanes) ------------------------
    w = jnp.zeros((VPAD, W_COLS), f32)
    w = w.at[0:V, 0:H].set(p["tok_emb"])
    w = w.at[0:H, C_QKV:C_QKV + H].set(p["wq"] * scale)          # scale folded
    w = w.at[0:H, C_QKV + 128:C_QKV + 128 + H].set(p["wk"])
    w = w.at[0:H, C_QKV + 256:C_QKV + 256 + H].set(p["wv"])
    w = w.at[0:H, C_W1:C_W1 + FF].set(p["w1"])
    w = w.at[0:FF, C_W2:C_W2 + H].set(p["w2"])
    for h in range(NH):
        w = w.at[16 * h:16 * h + DH, C_WO:C_WO + H].set(
            p["wo"][h * DH:(h + 1) * DH, :])
    w = w.at[0:H, C_FC:C_FC + OUT].set(p["wfc"])

    # ---- f32 bias / pos / mask slab (48 rows x 384 lanes) --------------------
    fv = jnp.zeros((FV_ROWS, FV_COLS), f32)
    fv = fv.at[0, 0:H].set(p["bq"] * scale)                      # fused QKV bias
    fv = fv.at[0, 128:128 + H].set(p["bk"])
    fv = fv.at[0, 256:256 + H].set(p["bv"])
    rows = [(1, "bo", H), (2, "ln1g", H), (3, "ln1b", H), (4, "bf1", FF),
            (5, "bf2", H), (6, "ln2g", H), (7, "ln2b", H), (8, "bfc", OUT)]
    for r, name, wd in rows:
        fv = fv.at[r, 0:wd].set(p[name])
    fv = fv.at[R_POS:R_POS + BS, 0:H].set(jnp.tile(p["pos_emb"], (B, 1)))
    grp = jnp.arange(BS) // S
    mask = jnp.where(grp[:, None] == grp[None, :], 0.0, -1e30).astype(f32)
    fv = fv.at[R_MASK:R_MASK + BS, 0:BS].set(mask)

    return {"w": w.astype(bf16), "fv": fv}


def make_params(key):
    ks = jax.random.split(key, 20)
    std = 0.02
    n = lambda k, shape: std * jax.random.normal(k, shape, jnp.float32)
    return {
        "tok_emb": n(ks[0], (V, H)),
        "pos_emb": n(ks[1], (S, H)),
        "wq": n(ks[2], (H, H)),  "bq": n(ks[3], (H,)),
        "wk": n(ks[4], (H, H)),  "bk": n(ks[5], (H,)),
        "wv": n(ks[6], (H, H)),  "bv": n(ks[7], (H,)),
        "wo": n(ks[8], (H, H)),  "bo": n(ks[9], (H,)),
        "ln1g": 1.0 + n(ks[10], (H,)), "ln1b": n(ks[11], (H,)),
        "w1": n(ks[12], (H, FF)), "bf1": n(ks[13], (FF,)),
        "w2": n(ks[14], (FF, H)), "bf2": n(ks[15], (H,)),
        "ln2g": 1.0 + n(ks[16], (H,)), "ln2b": n(ks[17], (H,)),
        "wfc": n(ks[18], (H, OUT)), "bfc": n(ks[19], (OUT,)),
    }


# ----------------------- pure-JAX reference (same numerics) ------------------
def reference_forward(ids, p):
    hi = jax.lax.Precision.HIGHEST

    def mmb(a, w):   # mirror the kernel: bf16 operands, f32 accumulation
        return jnp.dot(a.astype(jnp.bfloat16), w.astype(jnp.bfloat16),
                       preferred_element_type=jnp.float32)

    x = p["tok_emb"][ids] + p["pos_emb"][None]                   # (B, S, H)
    q = mmb(x, p["wq"]) + p["bq"]
    k = mmb(x, p["wk"]) + p["bk"]
    v = mmb(x, p["wv"]) + p["bv"]
    split = lambda t: t.reshape(B, S, NH, DH).transpose(0, 2, 1, 3)
    qh, kh, vh = split(q), split(k), split(v)
    s = jnp.einsum("bnqd,bnkd->bnqk", qh, kh, precision=hi) / math.sqrt(DH)
    pattn = jax.nn.softmax(s, axis=-1)
    ctx = jnp.einsum("bnqk,bnkd->bnqd", pattn, vh, precision=hi)
    ctx = ctx.transpose(0, 2, 1, 3).reshape(B, S, H)
    attn_out = mmb(ctx, p["wo"]) + p["bo"]
    h1 = _layer_norm(x + attn_out, p["ln1g"], p["ln1b"])
    ff = _gelu_tanh(mmb(h1, p["w1"]) + p["bf1"])
    ff = mmb(ff, p["w2"]) + p["bf2"]
    hidden = _layer_norm(h1 + ff, p["ln2g"], p["ln2b"])
    cls = hidden[:, 0, :]
    return mmb(jnp.tanh(cls), p["wfc"]) + p["bfc"]


if __name__ == "__main__":
    key = jax.random.PRNGKey(0)
    k_ids, k_par = jax.random.split(key)
    ids = jax.random.randint(k_ids, (B, S), 0, V, dtype=jnp.int32)
    params = make_params(k_par)
    packed = pack_params(params)

    pred = review_sentiment_forward(ids, packed)
    pred = jax.block_until_ready(pred)
    assert pred.shape == (B, OUT) and pred.dtype == jnp.float32
    assert bool(jnp.all(jnp.isfinite(pred)))

    ref = reference_forward(ids, params)
    assert bool(jnp.allclose(pred, ref, atol=2e-2, rtol=2e-2)), (pred, ref)
    print("KERNEL_OK")
</pallas_src>

<mosaic_0001>
module attributes {stable_mosaic.version = 11 : i64} {
  func.func @sentiment_kernel(%arg0: memref<16x1xi32, #tpu.memory_space<vmem>>, %arg1: memref<64x1024xbf16, #tpu.memory_space<vmem>>, %arg2: memref<48x384xf32, #tpu.memory_space<vmem>>, %arg3: memref<2x3xf32, #tpu.memory_space<vmem>>) attributes {dimension_semantics = [], scalar_prefetch = 0 : i64, scratch_operands = 0 : i64, tpu.core_type = #tpu.core_type<tc>} {
    %c0 = arith.constant 0 : index
    %c0_0 = arith.constant 0 : index
    %0 = vector.load %arg0[%c0, %c0_0] : memref<16x1xi32, #tpu.memory_space<vmem>>, vector<16x1xi32>
    %1 = tpu.iota {dimensions = array<i32: 1>} : vector<16x64xi32>
    %2 = vector.broadcast %0 : vector<16x1xi32> to vector<16x64xi32>
    %3 = arith.cmpi eq, %1, %2 : vector<16x64xi32>
    %cst = arith.constant 1.000000e+00 : f32
    %cst_1 = arith.constant 0.000000e+00 : f32
    %4 = vector.broadcast %cst : f32 to vector<16x64xf32>
    %5 = vector.broadcast %cst_1 : f32 to vector<16x64xf32>
    %6 = arith.select %3, %4, %5 : vector<16x64xi1>, vector<16x64xf32>
    %7 = arith.truncf %6 : vector<16x64xf32> to vector<16x64xbf16>
    %c0_2 = arith.constant 0 : index
    %c0_3 = arith.constant 0 : index
    %8 = vector.load %arg1[%c0_2, %c0_3] : memref<64x1024xbf16, #tpu.memory_space<vmem>>, vector<64x32xbf16>
    %cst_4 = arith.constant dense<0.000000e+00> : vector<16x32xf32>
    %9 = tpu.matmul %7, %8, %cst_4 {dimension_numbers = #tpu.dot_dimension_numbers<[1], [0], [0], [1], [0, 0, 1, 1], [], []>} : vector<16x64xbf16>, vector<64x32xbf16>, vector<16x32xf32> -> vector<16x32xf32>
    %c16 = arith.constant 16 : index
    %c0_5 = arith.constant 0 : index
    %10 = vector.load %arg2[%c16, %c0_5] : memref<48x384xf32, #tpu.memory_space<vmem>>, vector<16x32xf32>
    %11 = arith.addf %9, %10 : vector<16x32xf32>
    %c0_6 = arith.constant 0 : index
    %c128 = arith.constant 128 : index
    %12 = vector.load %arg1[%c0_6, %c128] : memref<64x1024xbf16, #tpu.memory_space<vmem>>, vector<32x384xbf16>
    %13 = arith.truncf %11 : vector<16x32xf32> to vector<16x32xbf16>
    %cst_7 = arith.constant dense<0.000000e+00> : vector<16x384xf32>
    %14 = tpu.matmul %13, %12, %cst_7 {dimension_numbers = #tpu.dot_dimension_numbers<[1], [0], [0], [1], [0, 0, 1, 1], [], []>} : vector<16x32xbf16>, vector<32x384xbf16>, vector<16x384xf32> -> vector<16x384xf32>
    %c0_8 = arith.constant 0 : index
    %c0_9 = arith.constant 0 : index
    %15 = vector.load %arg2[%c0_8, %c0_9] : memref<48x384xf32, #tpu.memory_space<vmem>>, vector<1x384xf32>
    %16 = vector.broadcast %15 : vector<1x384xf32> to vector<16x384xf32>
    %17 = arith.addf %14, %16 : vector<16x384xf32>
    %18 = vector.extract_strided_slice %17 {offsets = [0, 0], sizes = [16, 32], strides = [1, 1]} : vector<16x384xf32> to vector<16x32xf32>
    %19 = vector.extract_strided_slice %17 {offsets = [0, 128], sizes = [16, 32], strides = [1, 1]} : vector<16x384xf32> to vector<16x32xf32>
    %20 = vector.extract_strided_slice %17 {offsets = [0, 256], sizes = [16, 32], strides = [1, 1]} : vector<16x384xf32> to vector<16x32xf32>
    %c32 = arith.constant 32 : index
    %c0_10 = arith.constant 0 : index
    %21 = vector.load %arg2[%c32, %c0_10] : memref<48x384xf32, #tpu.memory_space<vmem>>, vector<16x16xf32>
    %22 = vector.extract_strided_slice %18 {offsets = [0, 0], sizes = [16, 8], strides = [1, 1]} : vector<16x32xf32> to vector<16x8xf32>
    %23 = arith.truncf %22 : vector<16x8xf32> to vector<16x8xbf16>
    %24 = vector.extract_strided_slice %19 {offsets = [0, 0], sizes = [16, 8], strides = [1, 1]} : vector<16x32xf32> to vector<16x8xf32>
    %25 = arith.truncf %24 : vector<16x8xf32> to vector<16x8xbf16>
    %cst_11 = arith.constant dense<0.000000e+00> : vector<16x16xf32>
    %26 = tpu.matmul %23, %25, %cst_11 {dimension_numbers = #tpu.dot_dimension_numbers<[1], [1], [0], [0], [0, 0, 1, 0], [], []>} : vector<16x8xbf16>, vector<16x8xbf16>, vector<16x16xf32> -> vector<16x16xf32>
    %27 = arith.addf %26, %21 : vector<16x16xf32>
    %cst_12 = arith.constant dense<0xFF800000> : vector<16xf32>
    %28 = vector.multi_reduction <maximumf>, %27, %cst_12 [1] : vector<16x16xf32> to vector<16xf32>
    %29 = vector.shape_cast %28 : vector<16xf32> to vector<16x1xf32>
    %30 = vector.broadcast %29 : vector<16x1xf32> to vector<16x16xf32>
    %31 = arith.subf %27, %30 : vector<16x16xf32>
    %32 = math.exp %31 : vector<16x16xf32>
    %33 = arith.truncf %32 : vector<16x16xf32> to vector<16x16xbf16>
    %34 = vector.extract_strided_slice %20 {offsets = [0, 0], sizes = [16, 8], strides = [1, 1]} : vector<16x32xf32> to vector<16x8xf32>
    %35 = arith.truncf %34 : vector<16x8xf32> to vector<16x8xbf16>
    %cst_13 = arith.constant dense<0.000000e+00> : vector<16x8xf32>
    %36 = tpu.matmul %33, %35, %cst_13 {dimension_numbers = #tpu.dot_dimension_numbers<[1], [0], [0], [1], [0, 0, 1, 1], [], []>} : vector<16x16xbf16>, vector<16x8xbf16>, vector<16x8xf32> -> vector<16x8xf32>
    %cst_14 = arith.constant dense<0.000000e+00> : vector<16xf32>
    %37 = vector.multi_reduction <add>, %32, %cst_14 [1] : vector<16x16xf32> to vector<16xf32>
    %38 = vector.shape_cast %37 : vector<16xf32> to vector<16x1xf32>
    %39 = tpu.reciprocal %38 {approx = true} : vector<16x1xf32> -> vector<16x1xf32>
    %40 = vector.broadcast %39 : vector<16x1xf32> to vector<16x8xf32>
    %41 = arith.mulf %36, %40 : vector<16x8xf32>
    %42 = vector.extract_strided_slice %18 {offsets = [0, 8], sizes = [16, 8], strides = [1, 1]} : vector<16x32xf32> to vector<16x8xf32>
    %43 = arith.truncf %42 : vector<16x8xf32> to vector<16x8xbf16>
    %44 = vector.extract_strided_slice %19 {offsets = [0, 8], sizes = [16, 8], strides = [1, 1]} : vector<16x32xf32> to vector<16x8xf32>
    %45 = arith.truncf %44 : vector<16x8xf32> to vector<16x8xbf16>
    %cst_15 = arith.constant dense<0.000000e+00> : vector<16x16xf32>
    %46 = tpu.matmul %43, %45, %cst_15 {dimension_numbers = #tpu.dot_dimension_numbers<[1], [1], [0], [0], [0, 0, 1, 0], [], []>} : vector<16x8xbf16>, vector<16x8xbf16>, vector<16x16xf32> -> vector<16x16xf32>
    %47 = arith.addf %46, %21 : vector<16x16xf32>
    %cst_16 = arith.constant dense<0xFF800000> : vector<16xf32>
    %48 = vector.multi_reduction <maximumf>, %47, %cst_16 [1] : vector<16x16xf32> to vector<16xf32>
    %49 = vector.shape_cast %48 : vector<16xf32> to vector<16x1xf32>
    %50 = vector.broadcast %49 : vector<16x1xf32> to vector<16x16xf32>
    %51 = arith.subf %47, %50 : vector<16x16xf32>
    %52 = math.exp %51 : vector<16x16xf32>
    %53 = arith.truncf %52 : vector<16x16xf32> to vector<16x16xbf16>
    %54 = vector.extract_strided_slice %20 {offsets = [0, 8], sizes = [16, 8], strides = [1, 1]} : vector<16x32xf32> to vector<16x8xf32>
    %55 = arith.truncf %54 : vector<16x8xf32> to vector<16x8xbf16>
    %cst_17 = arith.constant dense<0.000000e+00> : vector<16x8xf32>
    %56 = tpu.matmul %53, %55, %cst_17 {dimension_numbers = #tpu.dot_dimension_numbers<[1], [0], [0], [1], [0, 0, 1, 1], [], []>} : vector<16x16xbf16>, vector<16x8xbf16>, vector<16x8xf32> -> vector<16x8xf32>
    %cst_18 = arith.constant dense<0.000000e+00> : vector<16xf32>
    %57 = vector.multi_reduction <add>, %52, %cst_18 [1] : vector<16x16xf32> to vector<16xf32>
    %58 = vector.shape_cast %57 : vector<16xf32> to vector<16x1xf32>
    %59 = tpu.reciprocal %58 {approx = true} : vector<16x1xf32> -> vector<16x1xf32>
    %60 = vector.broadcast %59 : vector<16x1xf32> to vector<16x8xf32>
    %61 = arith.mulf %56, %60 : vector<16x8xf32>
    %62 = vector.extract_strided_slice %18 {offsets = [0, 16], sizes = [16, 8], strides = [1, 1]} : vector<16x32xf32> to vector<16x8xf32>
    %63 = arith.truncf %62 : vector<16x8xf32> to vector<16x8xbf16>
    %64 = vector.extract_strided_slice %19 {offsets = [0, 16], sizes = [16, 8], strides = [1, 1]} : vector<16x32xf32> to vector<16x8xf32>
    %65 = arith.truncf %64 : vector<16x8xf32> to vector<16x8xbf16>
    %cst_19 = arith.constant dense<0.000000e+00> : vector<16x16xf32>
    %66 = tpu.matmul %63, %65, %cst_19 {dimension_numbers = #tpu.dot_dimension_numbers<[1], [1], [0], [0], [0, 0, 1, 0], [], []>} : vector<16x8xbf16>, vector<16x8xbf16>, vector<16x16xf32> -> vector<16x16xf32>
    %67 = arith.addf %66, %21 : vector<16x16xf32>
    %cst_20 = arith.constant dense<0xFF800000> : vector<16xf32>
    %68 = vector.multi_reduction <maximumf>, %67, %cst_20 [1] : vector<16x16xf32> to vector<16xf32>
    %69 = vector.shape_cast %68 : vector<16xf32> to vector<16x1xf32>
    %70 = vector.broadcast %69 : vector<16x1xf32> to vector<16x16xf32>
    %71 = arith.subf %67, %70 : vector<16x16xf32>
    %72 = math.exp %71 : vector<16x16xf32>
    %73 = arith.truncf %72 : vector<16x16xf32> to vector<16x16xbf16>
    %74 = vector.extract_strided_slice %20 {offsets = [0, 16], sizes = [16, 8], strides = [1, 1]} : vector<16x32xf32> to vector<16x8xf32>
    %75 = arith.truncf %74 : vector<16x8xf32> to vector<16x8xbf16>
    %cst_21 = arith.constant dense<0.000000e+00> : vector<16x8xf32>
    %76 = tpu.matmul %73, %75, %cst_21 {dimension_numbers = #tpu.dot_dimension_numbers<[1], [0], [0], [1], [0, 0, 1, 1], [], []>} : vector<16x16xbf16>, vector<16x8xbf16>, vector<16x8xf32> -> vector<16x8xf32>
    %cst_22 = arith.constant dense<0.000000e+00> : vector<16xf32>
    %77 = vector.multi_reduction <add>, %72, %cst_22 [1] : vector<16x16xf32> to vector<16xf32>
    %78 = vector.shape_cast %77 : vector<16xf32> to vector<16x1xf32>
    %79 = tpu.reciprocal %78 {approx = true} : vector<16x1xf32> -> vector<16x1xf32>
    %80 = vector.broadcast %79 : vector<16x1xf32> to vector<16x8xf32>
    %81 = arith.mulf %76, %80 : vector<16x8xf32>
    %82 = vector.extract_strided_slice %18 {offsets = [0, 24], sizes = [16, 8], strides = [1, 1]} : vector<16x32xf32> to vector<16x8xf32>
    %83 = arith.truncf %82 : vector<16x8xf32> to vector<16x8xbf16>
    %84 = vector.extract_strided_slice %19 {offsets = [0, 24], sizes = [16, 8], strides = [1, 1]} : vector<16x32xf32> to vector<16x8xf32>
    %85 = arith.truncf %84 : vector<16x8xf32> to vector<16x8xbf16>
    %cst_23 = arith.constant dense<0.000000e+00> : vector<16x16xf32>
    %86 = tpu.matmul %83, %85, %cst_23 {dimension_numbers = #tpu.dot_dimension_numbers<[1], [1], [0], [0], [0, 0, 1, 0], [], []>} : vector<16x8xbf16>, vector<16x8xbf16>, vector<16x16xf32> -> vector<16x16xf32>
    %87 = arith.addf %86, %21 : vector<16x16xf32>
    %cst_24 = arith.constant dense<0xFF800000> : vector<16xf32>
    %88 = vector.multi_reduction <maximumf>, %87, %cst_24 [1] : vector<16x16xf32> to vector<16xf32>
    %89 = vector.shape_cast %88 : vector<16xf32> to vector<16x1xf32>
    %90 = vector.broadcast %89 : vector<16x1xf32> to vector<16x16xf32>
    %91 = arith.subf %87, %90 : vector<16x16xf32>
    %92 = math.exp %91 : vector<16x16xf32>
    %93 = arith.truncf %92 : vector<16x16xf32> to vector<16x16xbf16>
    %94 = vector.extract_strided_slice %20 {offsets = [0, 24], sizes = [16, 8], strides = [1, 1]} : vector<16x32xf32> to vector<16x8xf32>
    %95 = arith.truncf %94 : vector<16x8xf32> to vector<16x8xbf16>
    %cst_25 = arith.constant dense<0.000000e+00> : vector<16x8xf32>
    %96 = tpu.matmul %93, %95, %cst_25 {dimension_numbers = #tpu.dot_dimension_numbers<[1], [0], [0], [1], [0, 0, 1, 1], [], []>} : vector<16x16xbf16>, vector<16x8xbf16>, vector<16x8xf32> -> vector<16x8xf32>
    %cst_26 = arith.constant dense<0.000000e+00> : vector<16xf32>
    %97 = vector.multi_reduction <add>, %92, %cst_26 [1] : vector<16x16xf32> to vector<16xf32>
    %98 = vector.shape_cast %97 : vector<16xf32> to vector<16x1xf32>
    %99 = tpu.reciprocal %98 {approx = true} : vector<16x1xf32> -> vector<16x1xf32>
    %100 = vector.broadcast %99 : vector<16x1xf32> to vector<16x8xf32>
    %101 = arith.mulf %96, %100 : vector<16x8xf32>
    %c1 = arith.constant 1 : index
    %c0_27 = arith.constant 0 : index
    %102 = vector.load %arg2[%c1, %c0_27] : memref<48x384xf32, #tpu.memory_space<vmem>>, vector<1x32xf32>
    %c0_28 = arith.constant 0 : index
    %c768 = arith.constant 768 : index
    %103 = vector.load %arg1[%c0_28, %c768] : memref<64x1024xbf16, #tpu.memory_space<vmem>>, vector<8x32xbf16>
    %104 = arith.truncf %41 : vector<16x8xf32> to vector<16x8xbf16>
    %cst_29 = arith.constant dense<0.000000e+00> : vector<16x32xf32>
    %105 = tpu.matmul %104, %103, %cst_29 {dimension_numbers = #tpu.dot_dimension_numbers<[1], [0], [0], [1], [0, 0, 1, 1], [], []>} : vector<16x8xbf16>, vector<8x32xbf16>, vector<16x32xf32> -> vector<16x32xf32>
    %106 = vector.broadcast %102 : vector<1x32xf32> to vector<16x32xf32>
    %107 = arith.addf %106, %105 : vector<16x32xf32>
    %c16_30 = arith.constant 16 : index
    %c768_31 = arith.constant 768 : index
    %108 = vector.load %arg1[%c16_30, %c768_31] : memref<64x1024xbf16, #tpu.memory_space<vmem>>, vector<8x32xbf16>
    %109 = arith.truncf %61 : vector<16x8xf32> to vector<16x8xbf16>
    %cst_32 = arith.constant dense<0.000000e+00> : vector<16x32xf32>
    %110 = tpu.matmul %109, %108, %cst_32 {dimension_numbers = #tpu.dot_dimension_numbers<[1], [0], [0], [1], [0, 0, 1, 1], [], []>} : vector<16x8xbf16>, vector<8x32xbf16>, vector<16x32xf32> -> vector<16x32xf32>
    %111 = arith.addf %107, %110 : vector<16x32xf32>
    %c32_33 = arith.constant 32 : index
    %c768_34 = arith.constant 768 : index
    %112 = vector.load %arg1[%c32_33, %c768_34] : memref<64x1024xbf16, #tpu.memory_space<vmem>>, vector<8x32xbf16>
    %113 = arith.truncf %81 : vector<16x8xf32> to vector<16x8xbf16>
    %cst_35 = arith.constant dense<0.000000e+00> : vector<16x32xf32>
    %114 = tpu.matmul %113, %112, %cst_35 {dimension_numbers = #tpu.dot_dimension_numbers<[1], [0], [0], [1], [0, 0, 1, 1], [], []>} : vector<16x8xbf16>, vector<8x32xbf16>, vector<16x32xf32> -> vector<16x32xf32>
    %115 = arith.addf %111, %114 : vector<16x32xf32>
    %c48 = arith.constant 48 : index
    %c768_36 = arith.constant 768 : index
    %116 = vector.load %arg1[%c48, %c768_36] : memref<64x1024xbf16, #tpu.memory_space<vmem>>, vector<8x32xbf16>
    %117 = arith.truncf %101 : vector<16x8xf32> to vector<16x8xbf16>
    %cst_37 = arith.constant dense<0.000000e+00> : vector<16x32xf32>
    %118 = tpu.matmul %117, %116, %cst_37 {dimension_numbers = #tpu.dot_dimension_numbers<[1], [0], [0], [1], [0, 0, 1, 1], [], []>} : vector<16x8xbf16>, vector<8x32xbf16>, vector<16x32xf32> -> vector<16x32xf32>
    %119 = arith.addf %115, %118 : vector<16x32xf32>
    %120 = arith.addf %11, %119 : vector<16x32xf32>
    %c2 = arith.constant 2 : index
    %c0_38 = arith.constant 0 : index
    %121 = vector.load %arg2[%c2, %c0_38] : memref<48x384xf32, #tpu.memory_space<vmem>>, vector<1x32xf32>
    %c3 = arith.constant 3 : index
    %c0_39 = arith.constant 0 : index
    %122 = vector.load %arg2[%c3, %c0_39] : memref<48x384xf32, #tpu.memory_space<vmem>>, vector<1x32xf32>
    %cst_40 = arith.constant dense<0.000000e+00> : vector<16xf32>
    %123 = vector.multi_reduction <add>, %120, %cst_40 [1] : vector<16x32xf32> to vector<16xf32>
    %124 = vector.shape_cast %123 : vector<16xf32> to vector<16x1xf32>
    %cst_41 = arith.constant 3.200000e+01 : f32
    %125 = vector.broadcast %cst_41 : f32 to vector<16x1xf32>
    %126 = arith.divf %124, %125 : vector<16x1xf32>
    %127 = arith.mulf %120, %120 : vector<16x32xf32>
    %cst_42 = arith.constant dense<0.000000e+00> : vector<16xf32>
    %128 = vector.multi_reduction <add>, %127, %cst_42 [1] : vector<16x32xf32> to vector<16xf32>
    %129 = vector.shape_cast %128 : vector<16xf32> to vector<16x1xf32>
    %cst_43 = arith.constant 3.200000e+01 : f32
    %130 = vector.broadcast %cst_43 : f32 to vector<16x1xf32>
    %131 = arith.divf %129, %130 : vector<16x1xf32>
    %132 = arith.mulf %126, %126 : vector<16x1xf32>
    %133 = arith.subf %131, %132 : vector<16x1xf32>
    %134 = vector.broadcast %126 : vector<16x1xf32> to vector<16x32xf32>
    %135 = arith.subf %120, %134 : vector<16x32xf32>
    %cst_44 = arith.constant 9.99999996E-13 : f32
    %136 = vector.broadcast %cst_44 : f32 to vector<16x1xf32>
    %137 = arith.addf %133, %136 : vector<16x1xf32>
    %138 = math.rsqrt %137 : vector<16x1xf32>
    %139 = vector.broadcast %138 : vector<16x1xf32> to vector<16x32xf32>
    %140 = arith.mulf %135, %139 : vector<16x32xf32>
    %141 = vector.broadcast %121 : vector<1x32xf32> to vector<16x32xf32>
    %142 = arith.mulf %140, %141 : vector<16x32xf32>
    %143 = vector.broadcast %122 : vector<1x32xf32> to vector<16x32xf32>
    %144 = arith.addf %142, %143 : vector<16x32xf32>
    %c0_45 = arith.constant 0 : index
    %c512 = arith.constant 512 : index
    %145 = vector.load %arg1[%c0_45, %c512] : memref<64x1024xbf16, #tpu.memory_space<vmem>>, vector<32x64xbf16>
    %146 = arith.truncf %144 : vector<16x32xf32> to vector<16x32xbf16>
    %cst_46 = arith.constant dense<0.000000e+00> : vector<16x64xf32>
    %147 = tpu.matmul %146, %145, %cst_46 {dimension_numbers = #tpu.dot_dimension_numbers<[1], [0], [0], [1], [0, 0, 1, 1], [], []>} : vector<16x32xbf16>, vector<32x64xbf16>, vector<16x64xf32> -> vector<16x64xf32>
    %c4 = arith.constant 4 : index
    %c0_47 = arith.constant 0 : index
    %148 = vector.load %arg2[%c4, %c0_47] : memref<48x384xf32, #tpu.memory_space<vmem>>, vector<1x64xf32>
    %149 = vector.broadcast %148 : vector<1x64xf32> to vector<16x64xf32>
    %150 = arith.addf %147, %149 : vector<16x64xf32>
    %cst_48 = arith.constant 5.000000e-01 : f32
    %151 = vector.broadcast %cst_48 : f32 to vector<16x64xf32>
    %152 = arith.mulf %151, %150 : vector<16x64xf32>
    %cst_49 = arith.constant 4.471500e-02 : f32
    %153 = vector.broadcast %cst_49 : f32 to vector<16x64xf32>
    %154 = arith.mulf %153, %150 : vector<16x64xf32>
    %155 = arith.mulf %154, %150 : vector<16x64xf32>
    %156 = arith.mulf %155, %150 : vector<16x64xf32>
    %157 = arith.addf %150, %156 : vector<16x64xf32>
    %cst_50 = arith.constant 0.797884583 : f32
    %158 = vector.broadcast %cst_50 : f32 to vector<16x64xf32>
    %159 = arith.mulf %158, %157 : vector<16x64xf32>
    %160 = math.tanh %159 : vector<16x64xf32>
    %cst_51 = arith.constant 1.000000e+00 : f32
    %161 = vector.broadcast %cst_51 : f32 to vector<16x64xf32>
    %162 = arith.addf %161, %160 : vector<16x64xf32>
    %163 = arith.mulf %152, %162 : vector<16x64xf32>
    %c0_52 = arith.constant 0 : index
    %c640 = arith.constant 640 : index
    %164 = vector.load %arg1[%c0_52, %c640] : memref<64x1024xbf16, #tpu.memory_space<vmem>>, vector<64x32xbf16>
    %165 = arith.truncf %163 : vector<16x64xf32> to vector<16x64xbf16>
    %cst_53 = arith.constant dense<0.000000e+00> : vector<16x32xf32>
    %166 = tpu.matmul %165, %164, %cst_53 {dimension_numbers = #tpu.dot_dimension_numbers<[1], [0], [0], [1], [0, 0, 1, 1], [], []>} : vector<16x64xbf16>, vector<64x32xbf16>, vector<16x32xf32> -> vector<16x32xf32>
    %c5 = arith.constant 5 : index
    %c0_54 = arith.constant 0 : index
    %167 = vector.load %arg2[%c5, %c0_54] : memref<48x384xf32, #tpu.memory_space<vmem>>, vector<1x32xf32>
    %168 = vector.broadcast %167 : vector<1x32xf32> to vector<16x32xf32>
    %169 = arith.addf %166, %168 : vector<16x32xf32>
    %170 = arith.addf %144, %169 : vector<16x32xf32>
    %c6 = arith.constant 6 : index
    %c0_55 = arith.constant 0 : index
    %171 = vector.load %arg2[%c6, %c0_55] : memref<48x384xf32, #tpu.memory_space<vmem>>, vector<1x32xf32>
    %c7 = arith.constant 7 : index
    %c0_56 = arith.constant 0 : index
    %172 = vector.load %arg2[%c7, %c0_56] : memref<48x384xf32, #tpu.memory_space<vmem>>, vector<1x32xf32>
    %cst_57 = arith.constant dense<0.000000e+00> : vector<16xf32>
    %173 = vector.multi_reduction <add>, %170, %cst_57 [1] : vector<16x32xf32> to vector<16xf32>
    %174 = vector.shape_cast %173 : vector<16xf32> to vector<16x1xf32>
    %cst_58 = arith.constant 3.200000e+01 : f32
    %175 = vector.broadcast %cst_58 : f32 to vector<16x1xf32>
    %176 = arith.divf %174, %175 : vector<16x1xf32>
    %177 = arith.mulf %170, %170 : vector<16x32xf32>
    %cst_59 = arith.constant dense<0.000000e+00> : vector<16xf32>
    %178 = vector.multi_reduction <add>, %177, %cst_59 [1] : vector<16x32xf32> to vector<16xf32>
    %179 = vector.shape_cast %178 : vector<16xf32> to vector<16x1xf32>
    %cst_60 = arith.constant 3.200000e+01 : f32
    %180 = vector.broadcast %cst_60 : f32 to vector<16x1xf32>
    %181 = arith.divf %179, %180 : vector<16x1xf32>
    %182 = arith.mulf %176, %176 : vector<16x1xf32>
    %183 = arith.subf %181, %182 : vector<16x1xf32>
    %184 = vector.broadcast %176 : vector<16x1xf32> to vector<16x32xf32>
    %185 = arith.subf %170, %184 : vector<16x32xf32>
    %cst_61 = arith.constant 9.99999996E-13 : f32
    %186 = vector.broadcast %cst_61 : f32 to vector<16x1xf32>
    %187 = arith.addf %183, %186 : vector<16x1xf32>
    %188 = math.rsqrt %187 : vector<16x1xf32>
    %189 = vector.broadcast %188 : vector<16x1xf32> to vector<16x32xf32>
    %190 = arith.mulf %185, %189 : vector<16x32xf32>
    %191 = vector.broadcast %171 : vector<1x32xf32> to vector<16x32xf32>
    %192 = arith.mulf %190, %191 : vector<16x32xf32>
    %193 = vector.broadcast %172 : vector<1x32xf32> to vector<16x32xf32>
    %194 = arith.addf %192, %193 : vector<16x32xf32>
    %195 = math.tanh %194 : vector<16x32xf32>
    %c0_62 = arith.constant 0 : index
    %c896 = arith.constant 896 : index
    %196 = vector.load %arg1[%c0_62, %c896] : memref<64x1024xbf16, #tpu.memory_space<vmem>>, vector<32x3xbf16>
    %197 = arith.truncf %195 : vector<16x32xf32> to vector<16x32xbf16>
    %cst_63 = arith.constant dense<0.000000e+00> : vector<16x3xf32>
    %198 = tpu.matmul %197, %196, %cst_63 {dimension_numbers = #tpu.dot_dimension_numbers<[1], [0], [0], [1], [0, 0, 1, 1], [], []>} : vector<16x32xbf16>, vector<32x3xbf16>, vector<16x3xf32> -> vector<16x3xf32>
    %c8 = arith.constant 8 : index
    %c0_64 = arith.constant 0 : index
    %199 = vector.load %arg2[%c8, %c0_64] : memref<48x384xf32, #tpu.memory_space<vmem>>, vector<1x3xf32>
    %200 = vector.broadcast %199 : vector<1x3xf32> to vector<16x3xf32>
    %201 = arith.addf %198, %200 : vector<16x3xf32>
    %202 = vector.extract_strided_slice %201 {offsets = [0, 0], sizes = [1, 3], strides = [1, 1]} : vector<16x3xf32> to vector<1x3xf32>
    %203 = vector.extract_strided_slice %201 {offsets = [8, 0], sizes = [1, 3], strides = [1, 1]} : vector<16x3xf32> to vector<1x3xf32>
    %204 = tpu.concatenate %202, %203 in 0 : vector<1x3xf32>, vector<1x3xf32> -> vector<2x3xf32>
    %c0_65 = arith.constant 0 : index
    %c0_66 = arith.constant 0 : index
    %205 = vector.load %arg3[%c0_65, %c0_66] : memref<2x3xf32, #tpu.memory_space<vmem>>, vector<2x3xf32>
    tpu.vector_store %arg3[%c0_65, %c0_66], %204 {strides = array<i32>} : memref<2x3xf32, #tpu.memory_space<vmem>>, vector<2x3xf32>,
    return
  }
}

</mosaic_0001>

<bundles_post_ra>
// kernel: review_sentiment_forward.1
= control target key start
LH: loop header
LB: loop body
LE: loop exit
PB: predicated region body
PF: predicated region fallthrough
CT: control target
= control target key end

     0   :  { %8 = vsyncpa [#allocation3], 0  ;;  %s1813_s0 = inlined_call_operand.vmem [shape: s32[16,1], index: 0, kind: input, shape index: {}]   ;;  %s1814_s1 = inlined_call_operand.hbm [shape: bf16[64,1024], index: 1, kind: input, shape index: {}]   ;;  %s1815_s2 = inlined_call_operand.hbm [shape: f32[48,384], index: 2, kind: input, shape index: {}]   ;;  %s1816_s3 = inlined_call_operand.hbm [shape: f32[2,3], index: 3, kind: output, shape index: {}]  }
   0x1   :  { %9 = vsyncpa [#allocation6], 0 }
   0x2   :  { %10 = vsyncpa [#allocation4], 0  ;;  %s1626_s12 = smov [#allocation2]  }
   0x3   :  { %s18_s13 = sshll.u32 %s1626_s12, 4  ;;  %s19_s13 = int_to_ptr.vmem [resolvable:$true] %s18_s13 }
   0x4   :  { %s1568_s14 = scalar_lea.vmem %s19_s13, 4096  ;;  %p1573_p1 = scmp.lt.s32.totalorder %s19_s13, %s19_s13 }
   0x5   :  { %p1569_p0 = scmp.ne.s32.totalorder %s19_s13, %s1568_s14  ;;  %p1574_p2 = scmp.lt.s32.totalorder %s1568_s14, %s1568_s14 }
   0x7   :  { %p1575_p3 = por %p1574_p2, %p1573_p1 }
   0x9   :  { %p1576_p4 = pnand %p1575_p3, %p1569_p0 }
   0xb   :  { %1579 = shalt.err (!%p1576_p4)
}
   0xc   :  { %s1627_s15 = smov 512   ;;  %s1628_s16 = smov 32  }
   0xd   :  { %24 = dma.hbm_to_vmem [thread:$0]  %s1814_s1, 4096, %s19_s13, [#allocation3], %s1627_s15, %s1627_s15, %s1628_s16  }
   0xe   :  { %s1629_s19 = smov [#allocation5]  }
   0xf   :  { %s30_s20 = sshll.u32 %s1629_s19, 4  ;;  %s31_s20 = int_to_ptr.vmem [resolvable:$true] %s30_s20 }
  0x10   :  { %s1588_s21 = scalar_lea.vmem %s31_s20, 2304  ;;  %p1593_p6 = scmp.lt.s32.totalorder %s31_s20, %s31_s20 }
  0x11   :  { %p1589_p5 = scmp.ne.s32.totalorder %s31_s20, %s1588_s21  ;;  %p1594_p7 = scmp.lt.s32.totalorder %s1588_s21, %s1588_s21 }
  0x13   :  { %p1595_p8 = por %p1594_p7, %p1593_p6 }
  0x15   :  { %p1596_p9 = pnand %p1595_p8, %p1589_p5 }
  0x17   :  { %1599 = shalt.err (!%p1596_p9)
}
  0x18   :  { %s1630_s22 = smov 384   ;;  %s1631_s23 = smov 24  }
  0x19   :  { %36 = dma.hbm_to_vmem [thread:$0]  %s1815_s2, 2304, %s31_s20, [#allocation6], %s1630_s22, %s1630_s22, %s1631_s23  }
  0x1a   :  { %1620 = dma.done.wait [#allocation3], 4096  }
  0x1b   :  { %1621 = vsyncadd [#allocation3], 4294963200 }
  0x1c   :  { %1622 = dma.done.wait [#allocation6], 2304  }
  0x1d   :  { %1623 = vsyncadd [#allocation6], 4294964992  ;;  %v1632_v0 = vmov 0   ;;  %v1633_v1 = vmov 0.0   ;;  %v44_v2 = vld [vmem:[%s1813_s0] sm:$0xff]  ;;  %v45_v7 = vld [vmem:[%s1813_s0 + $0x8] sm:$0xff]  ;;  %v46_v16 = vlaneseq }
  0x1e   :  { %1511 = vset.pattern.permute.xlu0 %v1632_v0  ;;  %1378 = vmatprep.subr.bf16.mxu0 %v1633_v1  ;;  %v65_v3 = vld [vmem:[#allocation2 + $0xc0] sm:$0xf]  ;;  %vm1634_vm0 = vmmov 0   ;;  %vm93_vm3 = vcmask 523264   ;;  %v142_v23 = vld [vmem:[#allocation2 + $0x44] sm:$0xff]  ;;  %v67_v32 = vld [vmem:[#allocation5 + $0x30] sm:$0xff] }
  0x1f   :  { %232 = vmatprep.mubr.bf16.mxu1 %v1632_v0  ;;  %49 = vperm.xlu0 %1511, %v44_v2   ;;  %v66_v4 = vld [vmem:[#allocation2 + $0xe0] sm:$0xf]  ;;  %v47_v17 = vand.u32 127, %v46_v16  ;;  %v144_v24 = vld [vmem:[#allocation2 + $0x64] sm:$0xff]  ;;  %v143_v35 = vld [vmem:[#allocation2 + $0x4c] sm:$0xf] }
  0x20   :  { %v63_v5 = vld [vmem:[#allocation2 + $0x80] sm:$0xf]  ;;  %v1302_v8 = vcombine.low %v65_v3, %v66_v4  ;;  %1386 = vmatprep.mubr.msk.bf16.mxu0 %vm1634_vm0, %v1633_v1  ;;  %v1308_v25 = vcombine.high %v142_v23, %v144_v24  ;;  %v1307_v26 = vcombine.low %v142_v23, %v144_v24  ;;  %v138_v27 = vld [vmem:[#allocation2 + $0x4] sm:$0xff]  ;;  %v145_v36 = vld [vmem:[#allocation2 + $0x6c] sm:$0xf]  ;;  %vm196_vm4 = vcmask 261120  }
  0x21   :  { %v64_v6 = vld [vmem:[#allocation2 + $0xa0] sm:$0xf]  ;;  %v140_v28 = vld [vmem:[#allocation2 + $0x24] sm:$0xff]  ;;  %v1309_v41 = vcombine.low %v143_v35, %v145_v36  ;;  %v139_v43 = vld [vmem:[#allocation2 + $0xc] sm:$0xf]  ;;  %v150_v46 = vshrl.u32 %v46_v16, 7 }
  0x22   :  { %1379 = vmatpush3.bf16.msra.mxu0 %v1302_v8  ;;  %v1301_v9 = vcombine.low %v63_v5, %v64_v6  ;;  %v61_v10 = vld [vmem:[#allocation2 + $0x40] sm:$0xf]  ;;  %212 = vmatprep.subr.bf16.mxu1 %v1308_v25  ;;  %v1305_v29 = vcombine.high %v138_v27, %v140_v28  ;;  %v1304_v30 = vcombine.low %v138_v27, %v140_v28  ;;  %v68_v34 = vld [vmem:[#allocation5 + $0x48] sm:$0xff]  ;;  %vm288_vm5 = vcmask 64512   ;;  %s1635_s0 = smov 112   ;;  %s1636_s28 = smov 120  }
  0x23   :  { %52 = vperm.xlu0 %1511, %v45_v7   ;;  %1380 = vmatprep.subr.bf16.mxu0 %v1633_v1  ;;  %v62_v11 = vld [vmem:[#allocation2 + $0x60] sm:$0xf]  ;;  %v141_v44 = vld [vmem:[#allocation2 + $0x2c] sm:$0xf]  ;;  %v155_v47 = vsub.s32 1, %v150_v46  ;;  %v151_v51 = vsub.s32 0, %v150_v46 }
  0x24   :  { %v1300_v12 = vcombine.low %v61_v10, %v62_v11  ;;  %v59_v13 = vld [vmem:[#allocation2] sm:$0xf]  ;;  %213 = vmatpush1.bf16.msra.mxu1 %v1307_v26  ;;  %v1306_v45 = vcombine.low %v139_v43, %v141_v44  ;;  %v159_v54 = vsub.s32 2, %v150_v46  ;;  %s1637_s29 = smov 104   ;;  %vm336_vm6 = vcmask 130048   ;;  %s1638_s30 = smov [#allocation7]  }
  0x25   :  { %v60_v14 = vld [vmem:[#allocation2 + $0x20] sm:$0xf]  ;;  %214 = vmatprep.subr.bf16.mxu1 %v1305_v29  ;;  %vm777_vm7 = vcmask 1043456   ;;  %s1289_s4 = sshll.u32 %s1638_s30, 4  ;;  %vm1279_vm8 = vcmask 1040384   ;;  %vm1281_vm9 = vcmask 17408   ;;  %s1290_s4 = int_to_ptr.vmem [resolvable:$true] %s1289_s4 }
  0x26   :  { %1381 = vmatpush3.bf16.msra.mxu0 %v1301_v9  ;;  %v1299_v15 = vcombine.low %v59_v13, %v60_v14  ;;  %v147_v49 = vld [vmem:[#allocation5] ss:$8 sm:$0x7]  ;;  %s1600_s5 = scalar_lea.vmem %s1290_s4, 32  ;;  %p1605_p11 = scmp.lt.s32.totalorder %s1290_s4, %s1290_s4 }
  0x27   :  { %1382 = vmatprep.subr.bf16.mxu0 %v1633_v1  ;;  %v156_v52 = vrot.slane %v147_v49, %v155_v47  ;;  %v152_v56 = vrot.slane %v147_v49, %v151_v51  ;;  %v160_v62 = vrot.slane %v147_v49, %v159_v54  ;;  %p1601_p10 = scmp.ne.s32.totalorder %s1290_s4, %s1600_s5  ;;  %p1606_p12 = scmp.lt.s32.totalorder %s1600_s5, %s1600_s5 }
  0x28   :  { %215 = vmatpush1.bf16.msra.mxu1 %v1304_v30 }
  0x29   :  { %1390 = vmatprep.subr.bf16.mxu1 %v1633_v1  ;;  %p1607_p13 = por %p1606_p12, %p1605_p11 }
  0x2a   :  { %1383 = vmatpush3.bf16.msra.mxu0 %v1300_v12 }
  0x2b   :  { %1384 = vmatprep.subr.bf16.mxu0 %v1633_v1  ;;  %p1608_p0 = pnand %p1607_p13, %p1601_p10 }
  0x2e   :  { %1385 = vmatpush3.bf16.msra.mxu0 %v1299_v15 }
  0x2f   :  { %1398 = vmatprep.subr.bf16.mxu0 %v1633_v1 }
  0x9a   :  { %v50_v18 = vpop.permute.xlu0 %49 }
  0x9b   :  { %vm54_vm1 = vcmp.eq.s32.totalorder %v47_v17, %v50_v18  ;;  %v284_v18 = vld [vmem:[#allocation5 + $0x60] sm:$0xff] }
  0x9c   :  { %v56_v20 = vsel %vm54_vm1, 1.0, %v1633_v1 }
  0x9e   :  { %v53_v19 = vpop.permute.xlu0 %52 }
  0x9f   :  { %vm55_vm2 = vcmp.eq.s32.totalorder %v47_v17, %v53_v19 }
  0xa0   :  { %v57_v21 = vsel %vm55_vm2, 1.0, %v1633_v1 }
  0xa1   :  { %v58_v22 = vpack.c.bf16 %v57_v21, %v56_v20 }
  0xa3   :  { %1387 = vmatmul.mubr.msk.bf16.vlgmr.msra.gmra.mxu0 %vm93_vm3, %v58_v22  ;;  %v285_v22 = vld [vmem:[#allocation5 + $0x78] sm:$0xff] }
  0xa4   :  { %1400 = vmatprep.mubr.msk.bf16.mxu0 %vm1634_vm0, %v1633_v1 }
 0x163   :  { %v131_v31 = vpop.f32.mrf.mxu0 }
 0x164   :  { %v1684_v38 = vadd.f32 %v131_v31, %v67_v32 }
 0x165   :  { %v1388_v33 = vpop.f32.mrf.mxu0 }
 0x167   :  { %v134_v37 = vpop.f32.mrf.mxu0 }
 0x168   :  { %v1686_v39 = vadd.f32 %v134_v37, %v68_v34 }
 0x169   :  { %v1389_v40 = vpop.f32.mrf.mxu0 }
 0x16a   :  { %v146_v42 = vpack.c.bf16 %v1686_v39, %v1684_v38 }
 0x16c   :  { %1310 = vmatmul.mubr.msk.bf16.vlgmr.msra.gmra.mxu1 %vm196_vm4, %v146_v42 }
 0x16d   :  { %1391 = vmatpush3.bf16.msra.mxu1 %v1309_v41  ;;  %1394 = vmatprep.mubr.msk.bf16.mxu1 %vm1634_vm0, %v1633_v1 }
 0x16e   :  { %1392 = vmatprep.subr.bf16.mxu1 %v1633_v1 }
 0x171   :  { %1393 = vmatpush3.bf16.msra.mxu1 %v1306_v45 }
 0x172   :  { %1404 = vmatprep.subr.bf16.mxu1 %v1633_v1 }
 0x174   :  { %1395 = vmatmul.mubr.msk.bf16.vlgmr.msra.gmra.mxu1 %vm196_vm4, %v146_v42 }
 0x175   :  { %1406 = vmatprep.mubr.msk.bf16.mxu1 %vm1634_vm0, %v1633_v1 }
 0x22c   :  { %v234_v48 = vpop.f32.mrf.mxu1 }
 0x22d   :  { %v235_v0 = vadd.f32 %v234_v48, %v152_v56 }
 0x22e   :  { %v236_v50 = vpop.f32.mrf.mxu1 }
 0x22f   :  { %v237_v57 = vadd.f32 %v236_v50, %v156_v52 }
 0x230   :  { %v238_v53 = vpop.f32.mrf.mxu1 }
 0x231   :  { %v239_v60 = vadd.f32 %v238_v53, %v152_v56 }
 0x232   :  { %v240_v55 = vpop.f32.mrf.mxu1 }
 0x233   :  { %v241_v58 = vadd.f32 %v240_v55, %v156_v52  ;;  %v286_v4 = vpack.c.bf16 %v239_v60, %v235_v0 }
 0x234   :  { %v277_v59 = vpop.f32.mrf.mxu1 }
 0x235   :  { %v287_v61 = vpack.c.bf16 %v241_v58, %v237_v57  ;;  %v278_v5 = vadd.f32 %v277_v59, %v160_v62 }
 0x236   :  { %v1396_v63 = vpop.f32.mrf.mxu1 }
 0x237   :  { %531 = vrot.lane.b32.xlu0 %v287_v61, %s1635_s0  ;;  %409 = vrot.lane.b32.xlu1 %v287_v61, %s1636_s28  ;;  %v293_v2 = vsel %vm288_vm5, %v287_v61, 0 }
 0x238   :  { %v280_v3 = vpop.f32.mrf.mxu1  ;;  %1399 = vmatpush3.bf16.xpose.msra.mxu0 %v293_v2 }
 0x239   :  { %v281_v6 = vadd.f32 %v280_v3, %v160_v62  ;;  %1410 = vmatprep.subr.bf16.mxu0 %v1633_v1  ;;  %v772_v3 = vld [vmem:[#allocation2 + $0x18] sm:$0xf] }
 0x23a   :  { %v1397_v7 = vpop.f32.mrf.mxu1 }
 0x23b   :  { %v1702_v8 = vpack.c.bf16 %v281_v6, %v278_v5  ;;  %652 = vrot.lane.b32.xlu0 %v287_v61, %s1637_s29  ;;  %406 = vrot.lane.b32.xlu1 %v286_v4, %s1636_s28 }
 0x23d   :  { %1405 = vmatpush3.bf16.msra.mxu1 %v1702_v8 }
 0x23e   :  { %1416 = vmatprep.subr.bf16.mxu1 %v1633_v1 }
 0x23f   :  { %529 = vrot.lane.b32.xlu1 %v286_v4, %s1635_s0  ;;  %1401 = vmatmul.mubr.msk.bf16.vlgmr.msra.gmra.mxu0 %vm288_vm5, %v286_v4 }
 0x240   :  { %1412 = vmatprep.mubr.msk.bf16.mxu0 %vm1634_vm0, %v1633_v1 }
 0x243   :  { %650 = vrot.lane.b32.xlu1 %v286_v4, %s1637_s29  ;;  %v779_v4 = vsel %vm777_vm7, %v772_v3, 0 }
 0x2a9   :  { %v410_v9 = vpop.permute.xlu1 %409  ;;  %v532_v11 = vpop.permute.xlu0 %531 }
 0x2aa   :  { %v415_v10 = vsel %vm288_vm5, %v410_v9, 0  ;;  %v537_v13 = vsel %vm288_vm5, %v532_v11, 0 }
 0x2ab   :  { %1411 = vmatpush3.bf16.xpose.msra.mxu0 %v415_v10 }
 0x2ac   :  { %1422 = vmatprep.subr.bf16.mxu0 %v1633_v1 }
 0x2ad   :  { %v407_v12 = vpop.permute.xlu1 %406  ;;  %v653_v14 = vpop.permute.xlu0 %652 }
 0x2ae   :  { %v658_v16 = vsel %vm288_vm5, %v653_v14, 0 }
 0x2b1   :  { %v530_v15 = vpop.permute.xlu1 %529 }
 0x2b2   :  { %1413 = vmatmul.mubr.msk.bf16.vlgmr.msra.gmra.mxu0 %vm288_vm5, %v407_v12 }
 0x2b3   :  { %1423 = vmatpush3.bf16.xpose.msra.mxu0 %v537_v13  ;;  %1424 = vmatprep.mubr.msk.bf16.mxu0 %vm1634_vm0, %v1633_v1 }
 0x2b4   :  { %1434 = vmatprep.subr.bf16.mxu0 %v1633_v1 }
 0x2b5   :  { %v651_v17 = vpop.permute.xlu1 %650 }
 0x2ba   :  { %1425 = vmatmul.mubr.msk.bf16.vlgmr.msra.gmra.mxu0 %vm288_vm5, %v530_v15 }
 0x2bb   :  { %1435 = vmatpush3.bf16.xpose.msra.mxu0 %v658_v16  ;;  %1436 = vmatprep.mubr.msk.bf16.mxu0 %vm1634_vm0, %v1633_v1 }
 0x2bc   :  { %1446 = vmatprep.subr.bf16.mxu0 %v1633_v1 }
 0x2c2   :  { %1437 = vmatmul.mubr.msk.bf16.vlgmr.msra.gmra.mxu0 %vm288_vm5, %v651_v17 }
 0x2c3   :  { %1448 = vmatprep.mubr.msk.bf16.mxu0 %vm1634_vm0, %v1633_v1  ;;  %1447 = vmatpush3.bf16.msra.mxu0 %v779_v4 }
 0x2c4   :  { %1458 = vmatprep.subr.bf16.mxu0 %v1633_v1 }
 0x2ff   :  { %v329_v19 = vpop.f32.mrf.mxu0 }
 0x300   :  { %v330_v20 = vadd.f32 %v329_v19, %v284_v18 }
 0x301   :  { %v1402_v21 = vpop.f32.mrf.mxu0 }
 0x302   :  { %v337_v23 = vsel %vm336_vm6, %v330_v20, -inf }
 0x303   :  { %338 = vmax.xlane.f32.xlu0 %v337_v23  ;;  %v332_v24 = vpop.f32.mrf.mxu0 }
 0x304   :  { %v333_v25 = vadd.f32 %v332_v24, %v285_v22 }
 0x305   :  { %v1403_v26 = vpop.f32.mrf.mxu0 }
 0x306   :  { %v340_v27 = vsel %vm336_vm6, %v333_v25, -inf }
 0x307   :  { %341 = vmax.xlane.f32.xlu1 %v340_v27 }
 0x318   :  { %472 = vrot.lane.b32.xlu1 %v1702_v8, %s1636_s28 }
 0x372   :  { %v451_v28 = vpop.f32.mrf.mxu0 }
 0x373   :  { %v452_v29 = vadd.f32 %v451_v28, %v284_v18 }
 0x374   :  { %v1414_v30 = vpop.f32.mrf.mxu0 }
 0x375   :  { %v458_v31 = vsel %vm336_vm6, %v452_v29, -inf }
 0x376   :  { %459 = vmax.xlane.f32.xlu0 %v458_v31  ;;  %v454_v32 = vpop.f32.mrf.mxu0 }
 0x377   :  { %v455_v33 = vadd.f32 %v454_v32, %v285_v22 }
 0x378   :  { %v1415_v34 = vpop.f32.mrf.mxu0 }
 0x379   :  { %v461_v35 = vsel %vm336_vm6, %v455_v33, -inf }
 0x37a   :  { %462 = vmax.xlane.f32.xlu0 %v461_v35  ;;  %v573_v36 = vpop.f32.mrf.mxu0 }
 0x37b   :  { %v574_v37 = vadd.f32 %v573_v36, %v284_v18 }
 0x37c   :  { %v1426_v40 = vpop.f32.mrf.mxu0 }
 0x37d   :  { %v580_v41 = vsel %vm336_vm6, %v574_v37, -inf }
 0x37e   :  { %581 = vmax.xlane.f32.xlu1 %v580_v41  ;;  %v576_v42 = vpop.f32.mrf.mxu0 }
 0x37f   :  { %v577_v43 = vadd.f32 %v576_v42, %v285_v22 }
 0x380   :  { %v1427_v44 = vpop.f32.mrf.mxu0 }
 0x381   :  { %v583_v45 = vsel %vm336_vm6, %v577_v43, -inf  ;;  %v824_v44 = vld [vmem:[#allocation2 + $0x58] sm:$0xf] }
 0x382   :  { %584 = vmax.xlane.f32.xlu0 %v583_v45  ;;  %v694_v46 = vpop.f32.mrf.mxu0  ;;  %v830_v45 = vsel %vm777_vm7, %v824_v44, 0 }
 0x383   :  { %v695_v47 = vadd.f32 %v694_v46, %v284_v18 }
 0x384   :  { %v1438_v48 = vpop.f32.mrf.mxu0 }
 0x385   :  { %v701_v49 = vsel %vm336_vm6, %v695_v47, -inf }
 0x386   :  { %702 = vmax.xlane.f32.xlu1 %v701_v49  ;;  %v697_v50 = vpop.f32.mrf.mxu0 }
 0x387   :  { %v698_v51 = vadd.f32 %v697_v50, %v285_v22 }
 0x388   :  { %v1439_v52 = vpop.f32.mrf.mxu0 }
 0x389   :  { %v704_v53 = vsel %vm336_vm6, %v698_v51, -inf }
 0x38a   :  { %705 = vmax.xlane.f32.xlu0 %v704_v53 }
 0x38c   :  { %v339_v54 = vpop.xlane.xlu0 %338 }
 0x38d   :  { %v343_v55 = vsub.f32 %v330_v20, %v339_v54 }
 0x38f   :  { %v345_v56 = vmul.f32 1.442695, %v343_v55 }
 0x390   :  { %v342_v57 = vpop.xlane.xlu1 %341 }
 0x391   :  { %v344_v58 = vsub.f32 %v333_v25, %v342_v57  ;;  %1512 = vpow2.f32 %v345_v56 }
 0x393   :  { %v347_v59 = vmul.f32 1.442695, %v344_v58 }
 0x394   :  { %v473_v63 = vpop.permute.xlu1 %472 }
 0x395   :  { %1514 = vpow2.f32 %v347_v59 }
 0x397   :  { %714 = vrot.lane.b32.xlu1 %v1702_v8, %s1637_s29 }
 0x39e   :  { %v1513_v60 = vpop.eup %1512 }
 0x39f   :  { %v395_v0 = vsel %vm336_vm6, %v1513_v60, 0.0 }
 0x3a0   :  { %593 = vrot.lane.b32.xlu0 %v1702_v8, %s1635_s0 }
 0x3a2   :  { %v1515_v61 = vpop.eup %1514 }
 0x3a3   :  { %v349_v62 = vpack.c.bf16 %v1515_v61, %v1513_v60  ;;  %v398_v2 = vsel %vm336_vm6, %v1515_v61, 0.0 }
 0x3a5   :  { %1407 = vmatmul.mubr.msk.bf16.vlgmr.msra.gmra.mxu1 %vm336_vm6, %v349_v62 }
 0x3a6   :  { %1417 = vmatpush3.bf16.msra.mxu1 %v473_v63  ;;  %1418 = vmatprep.mubr.msk.bf16.mxu1 %vm1634_vm0, %v1633_v1 }
 0x3a7   :  { %1428 = vmatprep.subr.bf16.mxu1 %v1633_v1 }
 0x3bb   :  { %396 = vadd.xlane.f32.xlu1 %v395_v0 }
 0x3bf   :  { %399 = vadd.xlane.f32.xlu0 %v398_v2 }
 0x3ff   :  { %v460_v5 = vpop.xlane.xlu0 %459 }
 0x400   :  { %v464_v6 = vsub.f32 %v452_v29, %v460_v5  ;;  %v926_v5 = vld [vmem:[#allocation2 + $0xd8] sm:$0xf] }
 0x402   :  { %v466_v7 = vmul.f32 1.442695, %v464_v6 }
 0x403   :  { %v463_v8 = vpop.xlane.xlu0 %462 }
 0x404   :  { %1516 = vpow2.f32 %v466_v7  ;;  %v465_v9 = vsub.f32 %v455_v33, %v463_v8 }
 0x406   :  { %v468_v10 = vmul.f32 1.442695, %v465_v9 }
 0x407   :  { %v582_v11 = vpop.xlane.xlu1 %581 }
 0x408   :  { %1518 = vpow2.f32 %v468_v10  ;;  %v586_v12 = vsub.f32 %v574_v37, %v582_v11  ;;  %v932_v10 = vsel %vm777_vm7, %v926_v5, 0 }
 0x40a   :  { %v588_v13 = vmul.f32 1.442695, %v586_v12 }
 0x40b   :  { %v585_v14 = vpop.xlane.xlu0 %584 }
 0x40c   :  { %1520 = vpow2.f32 %v588_v13  ;;  %v587_v15 = vsub.f32 %v577_v43, %v585_v14 }
 0x40e   :  { %v590_v16 = vmul.f32 1.442695, %v587_v15 }
 0x40f   :  { %v703_v17 = vpop.xlane.xlu1 %702 }
 0x410   :  { %1522 = vpow2.f32 %v590_v16  ;;  %v707_v18 = vsub.f32 %v695_v47, %v703_v17 }
 0x411   :  { %v1517_v19 = vpop.eup %1516 }
 0x412   :  { %v709_v20 = vmul.f32 1.442695, %v707_v18  ;;  %v519_v21 = vsel %vm336_vm6, %v1517_v19, 0.0 }
 0x413   :  { %520 = vadd.xlane.f32.xlu0 %v519_v21  ;;  %v706_v22 = vpop.xlane.xlu0 %705  ;;  %v715_v34 = vpop.permute.xlu1 %714 }
 0x414   :  { %1524 = vpow2.f32 %v709_v20  ;;  %v708_v23 = vsub.f32 %v698_v51, %v706_v22  ;;  %v875_v51 = vld [vmem:[#allocation2 + $0x98] sm:$0xf] }
 0x415   :  { %v1519_v24 = vpop.eup %1518  ;;  %v881_v56 = vsel %vm777_vm7, %v875_v51, 0 }
 0x416   :  { %v711_v25 = vmul.f32 1.442695, %v708_v23  ;;  %v522_v26 = vsel %vm336_vm6, %v1519_v24, 0.0  ;;  %v470_v27 = vpack.c.bf16 %v1519_v24, %v1517_v19 }
 0x417   :  { %523 = vadd.xlane.f32.xlu1 %v522_v26  ;;  %v594_v28 = vpop.permute.xlu0 %593 }
 0x418   :  { %1526 = vpow2.f32 %v711_v25  ;;  %1419 = vmatmul.mubr.msk.bf16.vlgmr.msra.gmra.mxu1 %vm336_vm6, %v470_v27 }
 0x419   :  { %v1521_v29 = vpop.eup %1520  ;;  %1429 = vmatpush3.bf16.msra.mxu1 %v594_v28  ;;  %1430 = vmatprep.mubr.msk.bf16.mxu1 %vm1634_vm0, %v1633_v1 }
 0x41a   :  { %v640_v30 = vsel %vm336_vm6, %v1521_v29, 0.0  ;;  %1440 = vmatprep.subr.bf16.mxu1 %v1633_v1 }
 0x41b   :  { %641 = vadd.xlane.f32.xlu0 %v640_v30 }
 0x41d   :  { %v1523_v31 = vpop.eup %1522 }
 0x41e   :  { %v643_v32 = vsel %vm336_vm6, %v1523_v31, 0.0  ;;  %v592_v33 = vpack.c.bf16 %v1523_v31, %v1521_v29 }
 0x41f   :  { %644 = vadd.xlane.f32.xlu1 %v643_v32 }
 0x420   :  { %1431 = vmatmul.mubr.msk.bf16.vlgmr.msra.gmra.mxu1 %vm336_vm6, %v592_v33 }
 0x421   :  { %v1525_v35 = vpop.eup %1524  ;;  %1441 = vmatpush3.bf16.msra.mxu1 %v715_v34  ;;  %1442 = vmatprep.mubr.msk.bf16.mxu1 %vm1634_vm0, %v1633_v1 }
 0x422   :  { %v761_v36 = vsel %vm336_vm6, %v1525_v35, 0.0  ;;  %1452 = vmatprep.subr.bf16.mxu1 %v1633_v1 }
 0x423   :  { %762 = vadd.xlane.f32.xlu0 %v761_v36 }
 0x425   :  { %v1527_v37 = vpop.eup %1526 }
 0x426   :  { %v764_v40 = vsel %vm336_vm6, %v1527_v37, 0.0  ;;  %v713_v41 = vpack.c.bf16 %v1527_v37, %v1525_v35  ;;  %v771_v37 = vld [vmem:[#allocation5 + $0x1] ss:$0 sm:$0xff] }
 0x427   :  { %765 = vadd.xlane.f32.xlu1 %v764_v40 }
 0x428   :  { %1443 = vmatmul.mubr.msk.bf16.vlgmr.msra.gmra.mxu1 %vm336_vm6, %v713_v41 }
 0x429   :  { %1454 = vmatprep.mubr.msk.bf16.mxu1 %vm1634_vm0, %v1633_v1  ;;  %1453 = vmatpush3.bf16.msra.mxu1 %v830_v45 }
 0x42a   :  { %1464 = vmatprep.subr.bf16.mxu1 %v1633_v1 }
 0x444   :  { %v397_v42 = vpop.xlane.xlu1 %396 }
 0x445   :  { %1528 = vrcp.f32 %v397_v42 }
 0x448   :  { %v400_v43 = vpop.xlane.xlu0 %399 }
 0x449   :  { %1530 = vrcp.f32 %v400_v43 }
 0x452   :  { %v1529_v48 = vpop.eup %1528 }
 0x456   :  { %v1531_v49 = vpop.eup %1530 }
 0x465   :  { %v388_v46 = vpop.f32.mrf.mxu1 }
 0x466   :  { %v403_v52 = vmul.f32 %v1529_v48, %v388_v46 }
 0x467   :  { %v1408_v47 = vpop.f32.mrf.mxu1 }
 0x469   :  { %v391_v50 = vpop.f32.mrf.mxu1 }
 0x46a   :  { %v404_v53 = vmul.f32 %v1531_v49, %v391_v50 }
 0x46b   :  { %v1409_v54 = vpop.f32.mrf.mxu1 }
 0x46c   :  { %v773_v55 = vpack.c.bf16 %v404_v53, %v403_v52 }
 0x46e   :  { %1449 = vmatmul.mubr.msk.bf16.vlgmr.msra.gmra.mxu0 %vm288_vm5, %v773_v55 }
 0x46f   :  { %1459 = vmatpush3.bf16.msra.mxu0 %v881_v56  ;;  %1460 = vmatprep.mubr.msk.bf16.mxu0 %vm1634_vm0, %v1633_v1 }
 0x470   :  { %1470 = vmatprep.subr.bf16.mxu0 %v1633_v1 }
 0x49c   :  { %v521_v57 = vpop.xlane.xlu0 %520 }
 0x49d   :  { %1532 = vrcp.f32 %v521_v57 }
 0x4a0   :  { %v524_v58 = vpop.xlane.xlu1 %523 }
 0x4a1   :  { %1534 = vrcp.f32 %v524_v58 }
 0x4a4   :  { %v642_v59 = vpop.xlane.xlu0 %641 }
 0x4a5   :  { %1536 = vrcp.f32 %v642_v59 }
 0x4a8   :  { %v645_v60 = vpop.xlane.xlu1 %644 }
 0x4a9   :  { %1538 = vrcp.f32 %v645_v60 }
 0x4aa   :  { %v1533_v63 = vpop.eup %1532 }
 0x4ac   :  { %v763_v0 = vpop.xlane.xlu0 %762 }
 0x4ad   :  { %1540 = vrcp.f32 %v763_v0  ;;  %v1019_v0 = vld [vmem:[#allocation2 + $0x70] sm:$0xf] }
 0x4ae   :  { %v1535_v2 = vpop.eup %1534 }
 0x4b0   :  { %v766_v3 = vpop.xlane.xlu1 %765 }
 0x4b1   :  { %1542 = vrcp.f32 %v766_v3  ;;  %v1016_v3 = vld [vmem:[#allocation2 + $0x10] sm:$0xf] }
 0x4b2   :  { %v1537_v13 = vpop.eup %1536 }
 0x4b6   :  { %v1539_v14 = vpop.eup %1538 }
 0x4ba   :  { %v1541_v22 = vpop.eup %1540 }
 0x4be   :  { %v1543_v23 = vpop.eup %1542 }
 0x4d8   :  { %v512_v61 = vpop.f32.mrf.mxu1 }
 0x4d9   :  { %v527_v6 = vmul.f32 %v1533_v63, %v512_v61 }
 0x4da   :  { %v1420_v62 = vpop.f32.mrf.mxu1 }
 0x4dc   :  { %v515_v4 = vpop.f32.mrf.mxu1 }
 0x4dd   :  { %v528_v7 = vmul.f32 %v1535_v2, %v515_v4  ;;  %v1017_v4 = vld [vmem:[#allocation2 + $0x30] sm:$0xf] }
 0x4de   :  { %v1421_v8 = vpop.f32.mrf.mxu1  ;;  %v1324_v5 = vcombine.low %v1016_v3, %v1017_v4 }
 0x4df   :  { %v825_v9 = vpack.c.bf16 %v528_v7, %v527_v6 }
 0x4e0   :  { %v633_v11 = vpop.f32.mrf.mxu1 }
 0x4e1   :  { %1455 = vmatmul.mubr.msk.bf16.vlgmr.msra.gmra.mxu1 %vm288_vm5, %v825_v9  ;;  %v648_v16 = vmul.f32 %v1537_v13, %v633_v11 }
 0x4e2   :  { %v1432_v12 = vpop.f32.mrf.mxu1  ;;  %1465 = vmatpush3.bf16.msra.mxu1 %v932_v10  ;;  %1466 = vmatprep.mubr.msk.bf16.mxu1 %vm1634_vm0, %v1633_v1 }
 0x4e3   :  { %1478 = vmatprep.subr.bf16.mxu1 %v1633_v1 }
 0x4e4   :  { %v636_v15 = vpop.f32.mrf.mxu1 }
 0x4e5   :  { %v649_v17 = vmul.f32 %v1539_v14, %v636_v15 }
 0x4e6   :  { %v1433_v18 = vpop.f32.mrf.mxu1 }
 0x4e7   :  { %v876_v19 = vpack.c.bf16 %v649_v17, %v648_v16 }
 0x4e8   :  { %v754_v20 = vpop.f32.mrf.mxu1 }
 0x4e9   :  { %1461 = vmatmul.mubr.msk.bf16.vlgmr.msra.gmra.mxu0 %vm288_vm5, %v876_v19  ;;  %v769_v25 = vmul.f32 %v1541_v22, %v754_v20  ;;  %v979_v22 = vld [vmem:[#allocation5 + $0x2] ss:$0 sm:$0xff] }
 0x4ea   :  { %v1444_v21 = vpop.f32.mrf.mxu1  ;;  %1474 = vmatprep.mubr.msk.bf16.mxu0 %vm1634_vm0, %v1633_v1 }
 0x4ec   :  { %v757_v24 = vpop.f32.mrf.mxu1 }
 0x4ed   :  { %v770_v26 = vmul.f32 %v1543_v23, %v757_v24 }
 0x4ee   :  { %v1445_v27 = vpop.f32.mrf.mxu1 }
 0x4ef   :  { %v927_v28 = vpack.c.bf16 %v770_v26, %v769_v25  ;;  %v980_v27 = vld [vmem:[#allocation5 + $0x3] ss:$0 sm:$0xff] }
 0x4f1   :  { %1467 = vmatmul.mubr.msk.bf16.vlgmr.msra.gmra.mxu1 %vm288_vm5, %v927_v28 }
 0x4f2   :  { %1486 = vmatprep.mubr.msk.bf16.mxu1 %vm1634_vm0, %v1633_v1 }
 0x52e   :  { %v815_v29 = vpop.f32.mrf.mxu0 }
 0x52f   :  { %v822_v42 = vadd.f32 %v815_v29, %v771_v37 }
 0x530   :  { %v1450_v30 = vpop.f32.mrf.mxu0 }
 0x532   :  { %v818_v31 = vpop.f32.mrf.mxu0 }
 0x533   :  { %v823_v46 = vadd.f32 %v818_v31, %v771_v37 }
 0x534   :  { %v1451_v32 = vpop.f32.mrf.mxu0 }
 0x535   :  { %v1102_v32 = vld [vmem:[#allocation2 + $0xd4] sm:$0xf] }
 0x5a1   :  { %v866_v33 = vpop.f32.mrf.mxu1 }
 0x5a2   :  { %v873_v44 = vadd.f32 %v866_v33, %v822_v42  ;;  %v1103_v33 = vld [vmem:[#allocation2 + $0xf4] sm:$0xf] }
 0x5a3   :  { %v1456_v34 = vpop.f32.mrf.mxu1 }
 0x5a4   :  { %v1100_v34 = vld [vmem:[#allocation2 + $0x94] sm:$0xf] }
 0x5a5   :  { %v869_v35 = vpop.f32.mrf.mxu1 }
 0x5a6   :  { %v874_v49 = vadd.f32 %v869_v35, %v823_v46  ;;  %v1330_v35 = vcombine.low %v1102_v32, %v1103_v33  ;;  %v1021_v46 = vld [vmem:[#allocation5 + $0x4] ss:$0 sm:$0xff] }
 0x5a7   :  { %v1457_v36 = vpop.f32.mrf.mxu1 }
 0x5a8   :  { %v1101_v36 = vld [vmem:[#allocation2 + $0xb4] sm:$0xf]  ;;  %1479 = vmatpush3.bf16.msra.mxu1 %v1330_v35 }
 0x5a9   :  { %v917_v40 = vpop.f32.mrf.mxu0  ;;  %v1329_v37 = vcombine.low %v1100_v34, %v1101_v36  ;;  %1480 = vmatprep.subr.bf16.mxu1 %v1633_v1 }
 0x5aa   :  { %v924_v47 = vadd.f32 %v917_v40, %v873_v44  ;;  %v1098_v40 = vld [vmem:[#allocation2 + $0x54] sm:$0xf] }
 0x5ab   :  { %v1462_v41 = vpop.f32.mrf.mxu0  ;;  %v1097_v44 = vld [vmem:[#allocation2 + $0x34] sm:$0xf] }
 0x5ac   :  { %v1099_v41 = vld [vmem:[#allocation2 + $0x74] sm:$0xf]  ;;  %1481 = vmatpush3.bf16.msra.mxu1 %v1329_v37 }
 0x5ad   :  { %v920_v43 = vpop.f32.mrf.mxu0  ;;  %v1328_v42 = vcombine.low %v1098_v40, %v1099_v41  ;;  %1482 = vmatprep.subr.bf16.mxu1 %v1633_v1 }
 0x5ae   :  { %v925_v52 = vadd.f32 %v920_v43, %v874_v49  ;;  %v1096_v43 = vld [vmem:[#allocation2 + $0x14] sm:$0xf] }
 0x5af   :  { %v1463_v45 = vpop.f32.mrf.mxu0 }
 0x5b0   :  { %1483 = vmatpush3.bf16.msra.mxu1 %v1328_v42  ;;  %v1327_v45 = vcombine.low %v1096_v43, %v1097_v44 }
 0x5b1   :  { %v968_v48 = vpop.f32.mrf.mxu1  ;;  %1484 = vmatprep.subr.bf16.mxu1 %v1633_v1 }
 0x5b2   :  { %v975_v50 = vadd.f32 %v968_v48, %v924_v47 }
 0x5b3   :  { %v1468_v51 = vpop.f32.mrf.mxu1 }
 0x5b4   :  { %v977_v53 = vadd.f32 %v975_v50, %v1684_v38  ;;  %v1018_v38 = vld [vmem:[#allocation2 + $0x50] sm:$0xf]  ;;  %1485 = vmatpush3.bf16.msra.mxu1 %v1327_v45 }
 0x5b5   :  { %v971_v54 = vpop.f32.mrf.mxu1  ;;  %v1325_v2 = vcombine.low %v1018_v38, %v1019_v0 }
 0x5b6   :  { %v976_v55 = vadd.f32 %v971_v54, %v925_v52  ;;  %v981_v56 = vsel %vm196_vm4, %v977_v53, 0.0  ;;  %v990_v57 = vmul.f32 %v977_v53, %v977_v53 }
 0x5b7   :  { %v1469_v58 = vpop.f32.mrf.mxu1  ;;  %982 = vadd.xlane.f32.xlu0 %v981_v56  ;;  %1471 = vmatpush3.bf16.msra.mxu0 %v1325_v2 }
 0x5b8   :  { %v978_v59 = vadd.f32 %v976_v55, %v1686_v39  ;;  %v992_v60 = vsel %vm196_vm4, %v990_v57, 0.0  ;;  %1472 = vmatprep.subr.bf16.mxu0 %v1633_v1 }
 0x5ba   :  { %v984_v61 = vsel %vm196_vm4, %v978_v59, 0.0  ;;  %v991_v62 = vmul.f32 %v978_v59, %v978_v59 }
 0x5bb   :  { %993 = vadd.xlane.f32.xlu0 %v992_v60  ;;  %985 = vadd.xlane.f32.xlu1 %v984_v61 }
 0x5bc   :  { %v995_v63 = vsel %vm196_vm4, %v991_v62, 0.0  ;;  %1473 = vmatpush3.bf16.msra.mxu0 %v1324_v5 }
 0x5bd   :  { %1490 = vmatprep.subr.bf16.mxu0 %v1633_v1 }
 0x5bf   :  { %996 = vadd.xlane.f32.xlu1 %v995_v63 }
 0x640   :  { %v983_v39 = vpop.xlane.xlu0 %982 }
 0x641   :  { %v988_v6 = vmul.f32 0.03125, %v983_v39 }
 0x643   :  { %v1000_v9 = vmul.f32 %v988_v6, %v988_v6  ;;  %v1004_v19 = vsub.f32 %v977_v53, %v988_v6 }
 0x644   :  { %v994_v7 = vpop.xlane.xlu0 %993  ;;  %v986_v8 = vpop.xlane.xlu1 %985 }
 0x645   :  { %v998_v10 = vmul.f32 0.03125, %v994_v7  ;;  %v989_v11 = vmul.f32 0.03125, %v986_v8  ;;  %v1105_v7 = vld [vmem:[#allocation5 + $0x5] ss:$0 sm:$0xff] }
 0x647   :  { %v1002_v12 = vsub.f32 %v998_v10, %v1000_v9  ;;  %v1001_v15 = vmul.f32 %v989_v11, %v989_v11  ;;  %v1005_v23 = vsub.f32 %v978_v59, %v989_v11 }
 0x648   :  { %v997_v13 = vpop.xlane.xlu1 %996 }
 0x649   :  { %v1006_v14 = vadd.f32 1e-12, %v1002_v12  ;;  %v999_v16 = vmul.f32 0.03125, %v997_v13 }
 0x64b   :  { %1544 = vrsqrt.f32 %v1006_v14  ;;  %v1003_v17 = vsub.f32 %v999_v16, %v1001_v15 }
 0x64d   :  { %v1007_v18 = vadd.f32 1e-12, %v1003_v17 }
 0x64f   :  { %1546 = vrsqrt.f32 %v1007_v18 }
 0x658   :  { %v1545_v20 = vpop.eup %1544 }
 0x659   :  { %v1010_v21 = vmul.f32 %v1545_v20, %v1004_v19 }
 0x65b   :  { %v1012_v26 = vmul.f32 %v1010_v21, %v979_v22 }
 0x65c   :  { %v1547_v24 = vpop.eup %1546 }
 0x65d   :  { %v1011_v25 = vmul.f32 %v1547_v24, %v1005_v23  ;;  %v1014_v29 = vadd.f32 %v1012_v26, %v980_v27  ;;  %v1217_v23 = vld [vmem:[#allocation2 + $0x7c] sm:$0xf] }
 0x65e   :  { %v1214_v24 = vld [vmem:[#allocation2 + $0x1c] sm:$0xf] }
 0x65f   :  { %v1013_v28 = vmul.f32 %v1011_v25, %v979_v22  ;;  %v1216_v22 = vld [vmem:[#allocation2 + $0x5c] sm:$0xf] }
 0x660   :  { %v1333_v25 = vcombine.low %v1216_v22, %v1217_v23  ;;  %v1215_v26 = vld [vmem:[#allocation2 + $0x3c] sm:$0xf] }
 0x661   :  { %v1793_v30 = vadd.f32 %v1013_v28, %v980_v27  ;;  %v1332_v27 = vcombine.low %v1214_v24, %v1215_v26 }
 0x663   :  { %v1020_v31 = vpack.c.bf16 %v1793_v30, %v1014_v29 }
 0x665   :  { %1475 = vmatmul.mubr.msk.bf16.vlgmr.msra.gmra.mxu0 %vm196_vm4, %v1020_v31 }
 0x666   :  { %1494 = vmatprep.mubr.msk.bf16.mxu0 %vm1634_vm0, %v1633_v1  ;;  %1491 = vmatpush3.bf16.msra.mxu0 %v1333_v25 }
 0x667   :  { %1492 = vmatprep.subr.bf16.mxu0 %v1633_v1  ;;  %v1176_v1 = vld [vmem:[#allocation5 + $0x6] ss:$0 sm:$0xff] }
 0x66a   :  { %1493 = vmatpush3.bf16.msra.mxu0 %v1332_v27 }
 0x725   :  { %v1071_v47 = vpop.f32.mrf.mxu0 }
 0x726   :  { %v1072_v48 = vadd.f32 %v1071_v47, %v1021_v46  ;;  %v1177_v47 = vld [vmem:[#allocation5 + $0x7] ss:$0 sm:$0xff] }
 0x727   :  { %v1476_v49 = vpop.f32.mrf.mxu0 }
 0x728   :  { %v1080_v50 = vmul.f32 0.044715, %v1072_v48  ;;  %v1078_v2 = vmul.f32 0.5, %v1072_v48 }
 0x729   :  { %v1074_v51 = vpop.f32.mrf.mxu0 }
 0x72a   :  { %v1082_v52 = vmul.f32 %v1080_v50, %v1072_v48  ;;  %v1075_v53 = vadd.f32 %v1074_v51, %v1021_v46 }
 0x72b   :  { %v1477_v54 = vpop.f32.mrf.mxu0 }
 0x72c   :  { %v1084_v55 = vmul.f32 %v1082_v52, %v1072_v48  ;;  %v1081_v56 = vmul.f32 0.044715, %v1075_v53  ;;  %v1079_v3 = vmul.f32 0.5, %v1075_v53 }
 0x72e   :  { %v1086_v57 = vadd.f32 %v1084_v55, %v1072_v48  ;;  %v1083_v58 = vmul.f32 %v1081_v56, %v1075_v53 }
 0x730   :  { %v1088_v59 = vmul.f32 0.7978846, %v1086_v57  ;;  %v1085_v60 = vmul.f32 %v1083_v58, %v1075_v53 }
 0x732   :  { %1548 = vtanh.f32 %v1088_v59  ;;  %v1087_v61 = vadd.f32 %v1085_v60, %v1075_v53  ;;  %v1219_v60 = vld [vmem:[#allocation5 + $0x18] ss:$0 sm:$0xff] }
 0x734   :  { %v1089_v62 = vmul.f32 0.7978846, %v1087_v61 }
 0x736   :  { %1550 = vtanh.f32 %v1089_v62 }
 0x73f   :  { %v1549_v63 = vpop.eup %1548 }
 0x740   :  { %v1092_v38 = vadd.f32 1.0, %v1549_v63 }
 0x742   :  { %v1094_v5 = vmul.f32 %v1092_v38, %v1078_v2 }
 0x743   :  { %v1551_v0 = vpop.eup %1550 }
 0x744   :  { %v1093_v4 = vadd.f32 1.0, %v1551_v0 }
 0x746   :  { %v1095_v39 = vmul.f32 %v1093_v4, %v1079_v3 }
 0x748   :  { %v1104_v6 = vpack.c.bf16 %v1095_v39, %v1094_v5 }
 0x74a   :  { %1487 = vmatmul.mubr.msk.bf16.vlgmr.msra.gmra.mxu1 %vm93_vm3, %v1104_v6 }
 0x80a   :  { %v1167_v8 = vpop.f32.mrf.mxu1 }
 0x80b   :  { %v1168_v9 = vadd.f32 %v1167_v8, %v1105_v7 }
 0x80c   :  { %v1488_v10 = vpop.f32.mrf.mxu1 }
 0x80d   :  { %v1174_v11 = vadd.f32 %v1168_v9, %v1014_v29 }
 0x80e   :  { %v1170_v12 = vpop.f32.mrf.mxu1 }
 0x80f   :  { %v1171_v13 = vadd.f32 %v1170_v12, %v1105_v7  ;;  %v1178_v14 = vsel %vm196_vm4, %v1174_v11, 0.0  ;;  %v1186_v15 = vmul.f32 %v1174_v11, %v1174_v11 }
 0x810   :  { %1179 = vadd.xlane.f32.xlu0 %v1178_v14  ;;  %v1489_v16 = vpop.f32.mrf.mxu1 }
 0x811   :  { %v1175_v17 = vadd.f32 %v1171_v13, %v1793_v30  ;;  %v1188_v18 = vsel %vm196_vm4, %v1186_v15, 0.0 }
 0x813   :  { %v1181_v19 = vsel %vm196_vm4, %v1175_v17, 0.0  ;;  %v1187_v20 = vmul.f32 %v1175_v17, %v1175_v17 }
 0x814   :  { %1189 = vadd.xlane.f32.xlu0 %v1188_v18  ;;  %1182 = vadd.xlane.f32.xlu1 %v1181_v19 }
 0x815   :  { %v1191_v21 = vsel %vm196_vm4, %v1187_v20, 0.0 }
 0x818   :  { %1192 = vadd.xlane.f32.xlu1 %v1191_v21 }
 0x899   :  { %v1180_v28 = vpop.xlane.xlu0 %1179 }
 0x89a   :  { %v1184_v29 = vmul.f32 0.03125, %v1180_v28 }
 0x89c   :  { %v1196_v32 = vmul.f32 %v1184_v29, %v1184_v29  ;;  %v1200_v44 = vsub.f32 %v1174_v11, %v1184_v29 }
 0x89d   :  { %v1190_v30 = vpop.xlane.xlu0 %1189  ;;  %v1183_v31 = vpop.xlane.xlu1 %1182 }
 0x89e   :  { %v1194_v33 = vmul.f32 0.03125, %v1190_v30  ;;  %v1185_v34 = vmul.f32 0.03125, %v1183_v31 }
 0x8a0   :  { %v1198_v35 = vsub.f32 %v1194_v33, %v1196_v32  ;;  %v1197_v40 = vmul.f32 %v1185_v34, %v1185_v34  ;;  %v1201_v49 = vsub.f32 %v1175_v17, %v1185_v34 }
 0x8a1   :  { %v1193_v36 = vpop.xlane.xlu1 %1192 }
 0x8a2   :  { %v1202_v37 = vadd.f32 1e-12, %v1198_v35  ;;  %v1195_v41 = vmul.f32 0.03125, %v1193_v36 }
 0x8a4   :  { %1552 = vrsqrt.f32 %v1202_v37  ;;  %v1199_v42 = vsub.f32 %v1195_v41, %v1197_v40 }
 0x8a6   :  { %v1203_v43 = vadd.f32 1e-12, %v1199_v42 }
 0x8a8   :  { %1554 = vrsqrt.f32 %v1203_v43 }
 0x8b1   :  { %v1553_v45 = vpop.eup %1552 }
 0x8b2   :  { %v1206_v46 = vmul.f32 %v1553_v45, %v1200_v44 }
 0x8b4   :  { %v1208_v48 = vmul.f32 %v1206_v46, %v1176_v1 }
 0x8b5   :  { %v1555_v50 = vpop.eup %1554 }
 0x8b6   :  { %v1207_v51 = vmul.f32 %v1555_v50, %v1201_v49  ;;  %v1210_v52 = vadd.f32 %v1208_v48, %v1177_v47 }
 0x8b8   :  { %v1209_v53 = vmul.f32 %v1207_v51, %v1176_v1  ;;  %1556 = vtanh.f32 %v1210_v52 }
 0x8ba   :  { %v1211_v54 = vadd.f32 %v1209_v53, %v1177_v47 }
 0x8bc   :  { %1558 = vtanh.f32 %v1211_v54 }
 0x8c5   :  { %v1557_v55 = vpop.eup %1556 }
 0x8c9   :  { %v1559_v56 = vpop.eup %1558 }
 0x8ca   :  { %v1218_v57 = vpack.c.bf16 %v1559_v56, %v1557_v55 }
 0x8cc   :  { %1495 = vmatmul.mubr.msk.bf16.vlgmr.msra.gmra.mxu0 %vm196_vm4, %v1218_v57 }
 0x98c   :  { %v1269_v58 = vpop.f32.mrf.mxu0 }
 0x98d   :  { %v1270_v38 = vadd.f32 %v1269_v58, %v1219_v60 }
 0x98e   :  { %v1496_v59 = vpop.f32.mrf.mxu0 }
 0x990   :  { %v1272_v61 = vpop.f32.mrf.mxu0 }
 0x991   :  { %v1273_v62 = vadd.f32 %v1272_v61, %v1219_v60 }
 0x992   :  { %v1497_v63 = vpop.f32.mrf.mxu0 }
 0x993   :  { %v1277_v0 = vrot.slane %v1273_v62, 7 }
 0x995   :  { %v1280_v2 = vsel %vm1279_vm8, %v1270_v38, %v1277_v0 }
 0x996   :  { %1282 = vst.msk [vmem:[#allocation7] sm:$0x3] %vm1281_vm9, %v1280_v2 }
 0x997   :  { %1611 = shalt.err (!%p1608_p0)
}
 0x998   :  { %1292 = dma.vmem_to_hbm [thread:$0]  %s1290_s4, 32, %s1816_s3, [#allocation4]  }
 0x999   :  { %1624 = dma.done.wait [#allocation4], 32  }
 0x99a   :  { %1625 = vsyncadd [#allocation4], 4294967264 }
 0x99b   :  { %1296 = vsyncpa [#allocation3], 1 }
 0x99c   :  { %1297 = vsyncpa [#allocation6], 1 }
 0x99d   :  { %1298 = vsyncpa [#allocation4], 1 }

</bundles_post_ra>
